<compile_context>
chip_gen: v5e
topology: v5e:2x2
jax: 0.10.0
libtpu: 0.0.40
codegen_flags: <defaults>
</compile_context>

<pallas_src>
import math
import functools

import jax
import jax.numpy as jnp
from jax.experimental import pallas as pl
from jax.experimental.pallas import tpu as pltpu


_LANE = 128  # last-dim (lane) tile


def _round_up(x, m):
    return ((x + m - 1) // m) * m


def _sublane_for(dtype):
    # f32 -> 8 rows/sublane-tile, bf16 (2-byte) -> 16 (packs 2 rows per sublane).
    return 16 if jnp.dtype(dtype).itemsize == 2 else 8


def _physical_vmem_bytes():
    try:
        return int(pltpu.get_tpu_info().vmem_capacity_bytes)
    except Exception:
        return 64 * 1024 * 1024  # conservative: assume v7x-sized VMEM


def _pad2d(a, rows, cols, dtype):
    a = a.astype(dtype)
    if a.shape == (rows, cols):
        return a
    return jnp.zeros((rows, cols), dtype).at[: a.shape[0], : a.shape[1]].set(a)


def _choose_tile_b(b_eff, sublane, fits):
    """Pick the largest sublane-aligned batch tile that fits the VMEM budget.

    b_eff is the batch already rounded up to the sublane quantum.  For large
    batches we target tile_b >= 256 (MXU M-dim utilization); 512 only when it
    divides the batch exactly (no padded-compute waste).
    """
    cands = []
    if b_eff > 256:
        if b_eff % 512 == 0:
            cands.append(512)
        cands += [256, 128, 64, 32, 16, 8]
    else:
        cands.append(b_eff)          # small batch: one tile covering it all
        cands += [256, 128, 64, 32, 16, 8]
    cands = [c for c in cands if c % sublane == 0 and c <= max(b_eff, sublane)]
    for c in cands:
        if fits(c):
            return c
    return None


def _make_ffn_kernel(num_layers, compute_dtype):
    def kernel(x_ref, *rest):
        o_ref = rest[-1]
        wb = rest[:-1]
        h = x_ref[...]                            # (tile_b, in_pad), compute_dtype
        for l in range(num_layers):               # static unroll: fully fused stack
            w = wb[2 * l][...]                    # (in_pad_l, out_pad_l), compute_dtype
            b = wb[2 * l + 1][...]                # (1, out_pad_l), f32
            acc = jnp.dot(h, w, preferred_element_type=jnp.float32)   # MXU, f32 acc
            acc = jnp.maximum(acc + b, 0.0)       # bias + ReLU in f32 (VPU)
            # dropout: identity (eval mode).
            h = acc if l + 1 == num_layers else acc.astype(compute_dtype)
        o_ref[...] = h.astype(o_ref.dtype)
    return kernel


def feedforward_forward(x, params, *, compute_dtype=None):
    """Fused FeedForward: (Linear -> ReLU -> Dropout[eval]) x num_layers.

    x: [..., input_dim]; params: list of (w: [in_d, out_d], b: [out_d]).
    Weights are stored pre-transposed so the kernel computes relu(x @ W + b).
    """
    if compute_dtype is None:
        compute_dtype = jnp.bfloat16   # bf16-native MXU on v5e/v6e/v7x; f32 accumulation
    orig_dtype = x.dtype
    lead = x.shape[:-1]
    in_dim = x.shape[-1]
    x2 = x.reshape((-1, in_dim))
    B = x2.shape[0]
    num_layers = len(params)
    out_dim = params[-1][0].shape[1]

    cdt_bytes = jnp.dtype(compute_dtype).itemsize
    out_elem_bytes = jnp.dtype(orig_dtype).itemsize
    sublane = _sublane_for(compute_dtype)

    # ---- pad weights/biases to lane-dense shapes ---------------------------
    x_pad_feat = _round_up(in_dim, _LANE)
    padded = []
    out_pads = []
    prev_pad = x_pad_feat
    total_flops = 0
    wb_bytes = 0                       # single-buffered (pl.Buffered(1)) weight footprint
    for (w, b) in params:
        ind, outd = w.shape
        out_p = _round_up(outd, _LANE)
        wp = _pad2d(w, prev_pad, out_p, compute_dtype)
        bp = _pad2d(b.reshape((1, -1)), 1, out_p, jnp.float32)
        padded.append((wp, bp))
        out_pads.append(out_p)
        total_flops += 2 * B * ind * outd
        wb_bytes += prev_pad * out_p * cdt_bytes + out_p * 4
        prev_pad = out_p
    out_pad = out_pads[-1]
    max_feat = max([x_pad_feat] + out_pads)
    max_out = max(out_pads)

    # ---- chip-aware VMEM budgeting -----------------------------------------
    phys_vmem = _physical_vmem_bytes()
    vmem_budget = int(phys_vmem * 0.70)   # headroom for compiler scratch / spills

    def est_vmem(tb):
        x_blk = tb * x_pad_feat * cdt_bytes        # input tile (double-buffered)
        out_blk = tb * out_pad * out_elem_bytes    # output tile (double-buffered)
        acc_f32 = tb * max_out * 4                 # per-layer f32 accumulator (live)
        h_blk = tb * max_feat * cdt_bytes          # live compute-dtype activation
        return 2 * x_blk + 2 * out_blk + wb_bytes + acc_f32 + h_blk

    b_eff = _round_up(max(B, sublane), sublane)
    tile_b = _choose_tile_b(b_eff, sublane, lambda tb: est_vmem(tb) <= vmem_budget)
    if tile_b is None:
        # TODO(synk): per-layer K/N-tiled fallback for FFNs whose weights exceed VMEM.
        raise ValueError("FeedForward weights too large for fused VMEM-resident kernel")

    B_pad = _round_up(b_eff, tile_b)       # ragged batches pad up to a full tile
    grid = (B_pad // tile_b,)
    xp = _pad2d(x2, B_pad, x_pad_feat, compute_dtype)

    vmem_limit = int(min(vmem_budget, max(2 * est_vmem(tile_b), 32 * 1024 * 1024)))

    # ---- specs --------------------------------------------------------------
    single_buf = pl.Buffered(1)            # grid-invariant blocks: no double-buffering
    in_specs = [pl.BlockSpec((tile_b, x_pad_feat), lambda i: (i, 0))]
    flat_wb = []
    for (wp, bp) in padded:
        in_specs.append(pl.BlockSpec(wp.shape, lambda i: (0, 0), pipeline_mode=single_buf))
        in_specs.append(pl.BlockSpec(bp.shape, lambda i: (0, 0), pipeline_mode=single_buf))
        flat_wb += [wp, bp]
    out_specs = pl.BlockSpec((tile_b, out_pad), lambda i: (i, 0))

    bytes_accessed = int(xp.size * cdt_bytes + wb_bytes + B_pad * out_pad * out_elem_bytes)
    cost = pl.CostEstimate(flops=int(total_flops), transcendentals=0,
                           bytes_accessed=bytes_accessed)

    out = pl.pallas_call(
        _make_ffn_kernel(num_layers, compute_dtype),
        out_shape=jax.ShapeDtypeStruct((B_pad, out_pad), orig_dtype),
        grid_spec=pltpu.PrefetchScalarGridSpec(
            num_scalar_prefetch=0,
            grid=grid,
            in_specs=in_specs,
            out_specs=out_specs,
        ),
        compiler_params=pltpu.CompilerParams(
            dimension_semantics=("parallel",),
            vmem_limit_bytes=vmem_limit),
        cost_estimate=cost,
    )(xp, *flat_wb)

    out = out[:B, :out_dim]
    return out.reshape(lead + (out_dim,))


def init_feedforward_params(key, input_dim, num_layers, hidden_dim,
                            dtype=jnp.float32):
    """nn.Linear default init (uniform +-1/sqrt(fan_in)); W stored as [in, out]."""
    hidden_dims = [hidden_dim] * num_layers
    input_dims = [input_dim] + hidden_dims[:-1]
    params = []
    for in_d, out_d in zip(input_dims, hidden_dims):
        key, kw, kb = jax.random.split(key, 3)
        bound = 1.0 / math.sqrt(in_d)
        w = jax.random.uniform(kw, (in_d, out_d), dtype, minval=-bound, maxval=bound)
        b = jax.random.uniform(kb, (out_d,), dtype, minval=-bound, maxval=bound)
        params.append((w, b))
    return params


def feedforward_reference(x, params, compute_dtype=jnp.float32):
    out = x
    for w, b in params:
        acc = jnp.dot(out.astype(compute_dtype), w.astype(compute_dtype),
                      preferred_element_type=jnp.float32)
        out = jnp.maximum(acc + b.astype(jnp.float32), 0.0)
    return out.astype(x.dtype)


if __name__ == "__main__":
    key = jax.random.PRNGKey(0)
    batch, input_dim, hidden_dim, num_layers = 8, 16, 32, 3

    key, kx, kp = jax.random.split(key, 3)
    x = jax.random.normal(kx, (batch, input_dim), jnp.float32)
    params = init_feedforward_params(kp, input_dim, num_layers, hidden_dim)

    # f32 path: matches the PyTorch module in eval() mode.
    fwd_f32 = jax.jit(functools.partial(feedforward_forward,
                                        compute_dtype=jnp.float32))
    y = jax.block_until_ready(fwd_f32(x, params))
    y_ref = feedforward_reference(x, params, compute_dtype=jnp.float32)
    assert y.shape == (batch, hidden_dim), y.shape
    assert jnp.allclose(y, y_ref, atol=1e-4, rtol=1e-4), "f32 mismatch vs reference"

    # bf16 MXU path (f32 accumulation, 16-row sublane tiles): default on TPU.
    fwd_bf16 = jax.jit(functools.partial(feedforward_forward,
                                         compute_dtype=jnp.bfloat16))
    y16 = jax.block_until_ready(fwd_bf16(x, params))
    y16_ref = feedforward_reference(x, params, compute_dtype=jnp.bfloat16)
    assert y16.shape == (batch, hidden_dim), y16.shape
    assert jnp.allclose(y16, y16_ref, atol=2e-2, rtol=2e-2), "bf16 mismatch vs reference"

    print("KERNEL_OK")
</pallas_src>

<mosaic_0001>
module attributes {stable_mosaic.version = 11 : i64} {
  func.func @kernel(%arg0: i32, %arg1: memref<8x128xf32, #tpu.memory_space<vmem>>, %arg2: memref<128x128xf32, #tpu.memory_space<vmem>>, %arg3: memref<1x128xf32, #tpu.memory_space<vmem>>, %arg4: memref<128x128xf32, #tpu.memory_space<vmem>>, %arg5: memref<1x128xf32, #tpu.memory_space<vmem>>, %arg6: memref<128x128xf32, #tpu.memory_space<vmem>>, %arg7: memref<1x128xf32, #tpu.memory_space<vmem>>, %arg8: memref<8x128xf32, #tpu.memory_space<vmem>>) attributes {dimension_semantics = [#tpu.dimension_semantics<parallel>], iteration_bounds = array<i64: 1>, scalar_prefetch = 0 : i64, scratch_operands = 0 : i64, tpu.core_type = #tpu.core_type<tc>, window_params = [{transform_indices = @transform_0, window_bounds = array<i64: 8, 128>}, {pipeline_mode = #tpu.pipeline_mode<synchronous>, transform_indices = @transform_1, window_bounds = array<i64: 128, 128>}, {pipeline_mode = #tpu.pipeline_mode<synchronous>, transform_indices = @transform_2, window_bounds = array<i64: 1, 128>}, {pipeline_mode = #tpu.pipeline_mode<synchronous>, transform_indices = @transform_3, window_bounds = array<i64: 128, 128>}, {pipeline_mode = #tpu.pipeline_mode<synchronous>, transform_indices = @transform_4, window_bounds = array<i64: 1, 128>}, {pipeline_mode = #tpu.pipeline_mode<synchronous>, transform_indices = @transform_5, window_bounds = array<i64: 128, 128>}, {pipeline_mode = #tpu.pipeline_mode<synchronous>, transform_indices = @transform_6, window_bounds = array<i64: 1, 128>}, {transform_indices = @transform_7, window_bounds = array<i64: 8, 128>}]} {
    %c0 = arith.constant 0 : index
    %c0_0 = arith.constant 0 : index
    %0 = vector.load %arg1[%c0, %c0_0] : memref<8x128xf32, #tpu.memory_space<vmem>>, vector<8x128xf32>
    %c0_1 = arith.constant 0 : index
    %c0_2 = arith.constant 0 : index
    %1 = vector.load %arg2[%c0_1, %c0_2] : memref<128x128xf32, #tpu.memory_space<vmem>>, vector<128x128xf32>
    %c0_3 = arith.constant 0 : index
    %c0_4 = arith.constant 0 : index
    %2 = vector.load %arg3[%c0_3, %c0_4] : memref<1x128xf32, #tpu.memory_space<vmem>>, vector<1x128xf32>
    %cst = arith.constant dense<0.000000e+00> : vector<8x128xf32>
    %3 = tpu.matmul %0, %1, %cst {dimension_numbers = #tpu.dot_dimension_numbers<[1], [0], [0], [1], [0, 0, 1, 1], [], []>} : vector<8x128xf32>, vector<128x128xf32>, vector<8x128xf32> -> vector<8x128xf32>
    %4 = vector.broadcast %2 : vector<1x128xf32> to vector<8x128xf32>
    %5 = arith.addf %3, %4 : vector<8x128xf32>
    %cst_5 = arith.constant 0.000000e+00 : f32
    %6 = vector.broadcast %cst_5 : f32 to vector<8x128xf32>
    %7 = arith.maximumf %5, %6 : vector<8x128xf32>
    %c0_6 = arith.constant 0 : index
    %c0_7 = arith.constant 0 : index
    %8 = vector.load %arg4[%c0_6, %c0_7] : memref<128x128xf32, #tpu.memory_space<vmem>>, vector<128x128xf32>
    %c0_8 = arith.constant 0 : index
    %c0_9 = arith.constant 0 : index
    %9 = vector.load %arg5[%c0_8, %c0_9] : memref<1x128xf32, #tpu.memory_space<vmem>>, vector<1x128xf32>
    %cst_10 = arith.constant dense<0.000000e+00> : vector<8x128xf32>
    %10 = tpu.matmul %7, %8, %cst_10 {dimension_numbers = #tpu.dot_dimension_numbers<[1], [0], [0], [1], [0, 0, 1, 1], [], []>} : vector<8x128xf32>, vector<128x128xf32>, vector<8x128xf32> -> vector<8x128xf32>
    %11 = vector.broadcast %9 : vector<1x128xf32> to vector<8x128xf32>
    %12 = arith.addf %10, %11 : vector<8x128xf32>
    %cst_11 = arith.constant 0.000000e+00 : f32
    %13 = vector.broadcast %cst_11 : f32 to vector<8x128xf32>
    %14 = arith.maximumf %12, %13 : vector<8x128xf32>
    %c0_12 = arith.constant 0 : index
    %c0_13 = arith.constant 0 : index
    %15 = vector.load %arg6[%c0_12, %c0_13] : memref<128x128xf32, #tpu.memory_space<vmem>>, vector<128x128xf32>
    %c0_14 = arith.constant 0 : index
    %c0_15 = arith.constant 0 : index
    %16 = vector.load %arg7[%c0_14, %c0_15] : memref<1x128xf32, #tpu.memory_space<vmem>>, vector<1x128xf32>
    %cst_16 = arith.constant dense<0.000000e+00> : vector<8x128xf32>
    %17 = tpu.matmul %14, %15, %cst_16 {dimension_numbers = #tpu.dot_dimension_numbers<[1], [0], [0], [1], [0, 0, 1, 1], [], []>} : vector<8x128xf32>, vector<128x128xf32>, vector<8x128xf32> -> vector<8x128xf32>
    %18 = vector.broadcast %16 : vector<1x128xf32> to vector<8x128xf32>
    %19 = arith.addf %17, %18 : vector<8x128xf32>
    %cst_17 = arith.constant 0.000000e+00 : f32
    %20 = vector.broadcast %cst_17 : f32 to vector<8x128xf32>
    %21 = arith.maximumf %19, %20 : vector<8x128xf32>
    %c0_18 = arith.constant 0 : index
    %c0_19 = arith.constant 0 : index
    %22 = vector.load %arg8[%c0_18, %c0_19] : memref<8x128xf32, #tpu.memory_space<vmem>>, vector<8x128xf32>
    tpu.vector_store %arg8[%c0_18, %c0_19], %21 {strides = array<i32>} : memref<8x128xf32, #tpu.memory_space<vmem>>, vector<8x128xf32>,
    return
  }
  func.func @transform_0(%arg0: i32) -> (i32, i32) {
    %c0_i32 = arith.constant 0 : i32
    %c0_i32_0 = arith.constant 0 : i32
    return %arg0, %c0_i32 : i32, i32
  }
  func.func @transform_1(%arg0: i32) -> (i32, i32) {
    %c0_i32 = arith.constant 0 : i32
    %c0_i32_0 = arith.constant 0 : i32
    %c0_i32_1 = arith.constant 0 : i32
    return %c0_i32, %c0_i32_0 : i32, i32
  }
  func.func @transform_2(%arg0: i32) -> (i32, i32) {
    %c0_i32 = arith.constant 0 : i32
    %c0_i32_0 = arith.constant 0 : i32
    %c0_i32_1 = arith.constant 0 : i32
    return %c0_i32, %c0_i32_0 : i32, i32
  }
  func.func @transform_3(%arg0: i32) -> (i32, i32) {
    %c0_i32 = arith.constant 0 : i32
    %c0_i32_0 = arith.constant 0 : i32
    %c0_i32_1 = arith.constant 0 : i32
    return %c0_i32, %c0_i32_0 : i32, i32
  }
  func.func @transform_4(%arg0: i32) -> (i32, i32) {
    %c0_i32 = arith.constant 0 : i32
    %c0_i32_0 = arith.constant 0 : i32
    %c0_i32_1 = arith.constant 0 : i32
    return %c0_i32, %c0_i32_0 : i32, i32
  }
  func.func @transform_5(%arg0: i32) -> (i32, i32) {
    %c0_i32 = arith.constant 0 : i32
    %c0_i32_0 = arith.constant 0 : i32
    %c0_i32_1 = arith.constant 0 : i32
    return %c0_i32, %c0_i32_0 : i32, i32
  }
  func.func @transform_6(%arg0: i32) -> (i32, i32) {
    %c0_i32 = arith.constant 0 : i32
    %c0_i32_0 = arith.constant 0 : i32
    %c0_i32_1 = arith.constant 0 : i32
    return %c0_i32, %c0_i32_0 : i32, i32
  }
  func.func @transform_7(%arg0: i32) -> (i32, i32) {
    %c0_i32 = arith.constant 0 : i32
    %c0_i32_0 = arith.constant 0 : i32
    return %arg0, %c0_i32 : i32, i32
  }
}

</mosaic_0001>

<bundles_post_ra>
// kernel: feedforward_forward.1
= control target key start
LH: loop header
LB: loop body
LE: loop exit
PB: predicated region body
PF: predicated region fallthrough
CT: control target
= control target key end

     0   :  { %s398_s0 = inlined_call_operand.vmem [shape: f32[8,128], index: 0, kind: input, shape index: {}]   ;;  %s399_s1 = inlined_call_operand.vmem [shape: f32[128,128], index: 1, kind: input, shape index: {}]   ;;  %s400_s2 = inlined_call_operand.vmem [shape: f32[1,128], index: 2, kind: input, shape index: {}]   ;;  %s401_s3 = inlined_call_operand.vmem [shape: f32[128,128], index: 3, kind: input, shape index: {}]   ;;  %s402_s4 = inlined_call_operand.vmem [shape: f32[1,128], index: 4, kind: input, shape index: {}]   ;;  %s403_s5 = inlined_call_operand.vmem [shape: f32[128,128], index: 5, kind: input, shape index: {}]   ;;  %s404_s6 = inlined_call_operand.vmem [shape: f32[1,128], index: 6, kind: input, shape index: {}]   ;;  %s405_s7 = inlined_call_operand.hbm [shape: f32[8,128], index: 7, kind: output, shape index: {}]  }
   0x1   :  { %v43_v0 = vld [vmem:[%s399_s1 + $0x78] sm:$0xff]  ;;  %v42_v1 = vld [vmem:[%s399_s1 + $0x70] sm:$0xff]  ;;  %v41_v2 = vld [vmem:[%s399_s1 + $0x68] sm:$0xff] }
   0x2   :  { %48 = vmatpush.msra.mxu0 %v43_v0  ;;  %v40_v3 = vld [vmem:[%s399_s1 + $0x60] sm:$0xff]  ;;  %v84_v4 = vld [vmem:[%s401_s3 + $0x78] sm:$0xff]  ;;  %v83_v6 = vld [vmem:[%s401_s3 + $0x70] sm:$0xff] }
   0x3   :  { %v39_v5 = vld [vmem:[%s399_s1 + $0x58] sm:$0xff]  ;;  %89 = vmatpush.msra.mxu1 %v84_v4  ;;  %v82_v7 = vld [vmem:[%s401_s3 + $0x68] sm:$0xff]  ;;  %v38_v8 = vld [vmem:[%s399_s1 + $0x50] sm:$0xff] }
   0x4   :  { %49 = vmatpush.msra.mxu0 %v42_v1  ;;  %v81_v9 = vld [vmem:[%s401_s3 + $0x60] sm:$0xff]  ;;  %v37_v10 = vld [vmem:[%s399_s1 + $0x48] sm:$0xff]  ;;  %v80_v11 = vld [vmem:[%s401_s3 + $0x58] sm:$0xff] }
   0x5   :  { %90 = vmatpush.msra.mxu1 %v83_v6 }
   0x6   :  { %50 = vmatpush.msra.mxu0 %v41_v2 }
   0x7   :  { %91 = vmatpush.msra.mxu1 %v82_v7 }
   0x8   :  { %51 = vmatpush.msra.mxu0 %v40_v3 }
   0xa   :  { %52 = vmatpush.msra.mxu0 %v39_v5 }
   0xc   :  { %53 = vmatpush.msra.mxu0 %v38_v8 }
   0xd   :  { %12 = vsyncpa [#allocation3], 0  ;;  %v36_v12 = vld [vmem:[%s399_s1 + $0x40] sm:$0xff]  ;;  %92 = vmatpush.msra.mxu1 %v81_v9  ;;  %v79_v13 = vld [vmem:[%s401_s3 + $0x50] sm:$0xff]  ;;  %s198_s29 = smov [#allocation2]  }
   0xe   :  { %54 = vmatpush.msra.mxu0 %v37_v10  ;;  %v35_v14 = vld [vmem:[%s399_s1 + $0x38] sm:$0xff]  ;;  %v78_v15 = vld [vmem:[%s401_s3 + $0x48] sm:$0xff]  ;;  %v34_v16 = vld [vmem:[%s399_s1 + $0x30] sm:$0xff]  ;;  %s157_s30 = sshll.u32 %s198_s29, 4  ;;  %s158_s30 = int_to_ptr.vmem [resolvable:$true] %s157_s30 }
   0xf   :  { %93 = vmatpush.msra.mxu1 %v80_v11  ;;  %v77_v17 = vld [vmem:[%s401_s3 + $0x40] sm:$0xff]  ;;  %v33_v18 = vld [vmem:[%s399_s1 + $0x28] sm:$0xff]  ;;  %v76_v19 = vld [vmem:[%s401_s3 + $0x38] sm:$0xff] }
  0x10   :  { %55 = vmatpush.msra.mxu0 %v36_v12  ;;  %v32_v20 = vld [vmem:[%s399_s1 + $0x20] sm:$0xff]  ;;  %v75_v21 = vld [vmem:[%s401_s3 + $0x30] sm:$0xff]  ;;  %v31_v22 = vld [vmem:[%s399_s1 + $0x18] sm:$0xff] }
  0x11   :  { %94 = vmatpush.msra.mxu1 %v79_v13  ;;  %v74_v23 = vld [vmem:[%s401_s3 + $0x28] sm:$0xff]  ;;  %v30_v24 = vld [vmem:[%s399_s1 + $0x10] sm:$0xff]  ;;  %v73_v25 = vld [vmem:[%s401_s3 + $0x20] sm:$0xff] }
  0x12   :  { %56 = vmatpush.msra.mxu0 %v35_v14  ;;  %v29_v26 = vld [vmem:[%s399_s1 + $0x8] sm:$0xff]  ;;  %v72_v27 = vld [vmem:[%s401_s3 + $0x18] sm:$0xff]  ;;  %v28_v28 = vld [vmem:[%s399_s1] sm:$0xff] }
  0x13   :  { %95 = vmatpush.msra.mxu1 %v78_v15  ;;  %v27_v29 = vld [vmem:[%s398_s0] sm:$0xff]  ;;  %v71_v30 = vld [vmem:[%s401_s3 + $0x10] sm:$0xff]  ;;  %v70_v31 = vld [vmem:[%s401_s3 + $0x8] sm:$0xff] }
  0x14   :  { %57 = vmatpush.msra.mxu0 %v34_v16  ;;  %v69_v32 = vld [vmem:[%s401_s3] sm:$0xff]  ;;  %v125_v33 = vld [vmem:[%s403_s5 + $0x78] sm:$0xff]  ;;  %v124_v34 = vld [vmem:[%s403_s5 + $0x70] sm:$0xff] }
  0x15   :  { %96 = vmatpush.msra.mxu1 %v77_v17  ;;  %130 = vmatpush.msra.mxu2 %v125_v33  ;;  %v123_v35 = vld [vmem:[%s403_s5 + $0x68] sm:$0xff]  ;;  %v122_v36 = vld [vmem:[%s403_s5 + $0x60] sm:$0xff]  ;;  %v121_v37 = vld [vmem:[%s403_s5 + $0x58] sm:$0xff] }
  0x16   :  { %58 = vmatpush.msra.mxu0 %v33_v18  ;;  %v120_v38 = vld [vmem:[%s403_s5 + $0x50] sm:$0xff]  ;;  %v119_v39 = vld [vmem:[%s403_s5 + $0x48] sm:$0xff]  ;;  %v118_v40 = vld [vmem:[%s403_s5 + $0x40] sm:$0xff] }
  0x17   :  { %97 = vmatpush.msra.mxu1 %v76_v19  ;;  %131 = vmatpush.msra.mxu2 %v124_v34  ;;  %v117_v41 = vld [vmem:[%s403_s5 + $0x38] sm:$0xff]  ;;  %v116_v42 = vld [vmem:[%s403_s5 + $0x30] sm:$0xff]  ;;  %v115_v43 = vld [vmem:[%s403_s5 + $0x28] sm:$0xff] }
  0x18   :  { %59 = vmatpush.msra.mxu0 %v32_v20  ;;  %v114_v44 = vld [vmem:[%s403_s5 + $0x20] sm:$0xff]  ;;  %v113_v45 = vld [vmem:[%s403_s5 + $0x18] sm:$0xff]  ;;  %v112_v50 = vld [vmem:[%s403_s5 + $0x10] sm:$0xff] }
  0x19   :  { %98 = vmatpush.msra.mxu1 %v75_v21  ;;  %132 = vmatpush.msra.mxu2 %v123_v35  ;;  %v169_v46 = vld [vmem:[%s400_s2] ss:$0 sm:$0xff]  ;;  %v111_v51 = vld [vmem:[%s403_s5 + $0x8] sm:$0xff] }
  0x1a   :  { %60 = vmatpush.msra.mxu0 %v31_v22  ;;  %v110_v52 = vld [vmem:[%s403_s5] sm:$0xff]  ;;  %s159_s5 = sshll.u32 %s405_s7, 4  ;;  %s160_s5 = int_to_ptr.hbm [resolvable:$true] %s159_s5 }
  0x1b   :  { %99 = vmatpush.msra.mxu1 %v74_v23  ;;  %133 = vmatpush.msra.mxu2 %v122_v36  ;;  %v170_v53 = vld [vmem:[%s402_s4] ss:$0 sm:$0xff] }
  0x1c   :  { %61 = vmatpush.msra.mxu0 %v30_v24  ;;  %v171_v57 = vld [vmem:[%s404_s6] ss:$0 sm:$0xff] }
  0x1d   :  { %100 = vmatpush.msra.mxu1 %v73_v25  ;;  %134 = vmatpush.msra.mxu2 %v121_v37 }
  0x1e   :  { %62 = vmatpush.msra.mxu0 %v29_v26 }
  0x1f   :  { %101 = vmatpush.msra.mxu1 %v72_v27  ;;  %135 = vmatpush.msra.mxu2 %v120_v38 }
  0x20   :  { %63 = vmatpush.msra.mxu0 %v28_v28 }
  0x21   :  { %64 = vmatmul.f32.vlgmr.msra.gmra.mxu0 %v27_v29  ;;  %102 = vmatpush.msra.mxu1 %v71_v30 }
  0x22   :  { %136 = vmatpush.msra.mxu2 %v119_v39 }
  0x23   :  { %103 = vmatpush.msra.mxu1 %v70_v31 }
  0x24   :  { %137 = vmatpush.msra.mxu2 %v118_v40 }
  0x25   :  { %104 = vmatpush.msra.mxu1 %v69_v32 }
  0x26   :  { %138 = vmatpush.msra.mxu2 %v117_v41 }
  0x28   :  { %139 = vmatpush.msra.mxu2 %v116_v42 }
  0x2a   :  { %140 = vmatpush.msra.mxu2 %v115_v43 }
  0x2c   :  { %141 = vmatpush.msra.mxu2 %v114_v44 }
  0x2e   :  { %142 = vmatpush.msra.mxu2 %v113_v45 }
  0x30   :  { %143 = vmatpush.msra.mxu2 %v112_v50 }
  0x32   :  { %144 = vmatpush.msra.mxu2 %v111_v51 }
  0x34   :  { %145 = vmatpush.msra.mxu2 %v110_v52 }
  0x9e   :  { %v65_v47 = vpop.f32.mrf.mxu0 }
  0x9f   :  { %v66_v48 = vadd.f32 %v169_v46, %v65_v47 }
  0xa1   :  { %v68_v49 = vmax.f32 %v66_v48, 0.0 }
  0xa3   :  { %105 = vmatmul.f32.vlgmr.msra.gmra.mxu1 %v68_v49 }
 0x120   :  { %v106_v54 = vpop.f32.mrf.mxu1 }
 0x121   :  { %v107_v55 = vadd.f32 %v170_v53, %v106_v54 }
 0x123   :  { %v109_v56 = vmax.f32 %v107_v55, 0.0 }
 0x125   :  { %146 = vmatmul.f32.vlgmr.msra.gmra.mxu2 %v109_v56 }
 0x1a8   :  { %v147_v58 = vpop.f32.mrf.mxu2 }
 0x1a9   :  { %v148_v59 = vadd.f32 %v171_v57, %v147_v58 }
 0x1ab   :  { %v150_v60 = vmax.f32 %v148_v59, 0.0 }
 0x1ad   :  { %151 = vst [vmem:[#allocation2] sm:$0xff] %v150_v60 }
 0x1ae   :  { %162 = dma.vmem_to_hbm [thread:$0]  %s158_s30, 128, %s160_s5, [#allocation3]  }
 0x1af   :  { %196 = dma.done.wait [#allocation3], 128  }
 0x1b0   :  { %197 = vsyncadd [#allocation3], 4294967168 }
 0x1b1   :  { %167 = vsyncpa [#allocation3], 1 }

</bundles_post_ra>
